<compile_context>
chip_gen: v6e
topology: v6e:2x2x1
jax: 0.10.0
libtpu: 0.0.40
codegen_flags: <defaults>
</compile_context>

<pallas_src>
import jax
import jax.numpy as jnp
from jax import lax
from jax.experimental import pallas as pl
from jax.experimental.pallas import tpu as pltpu


def _reg_loss_kernel(ind_ref, feat_ref, mask_ref, target_ref, loss_ref, pred_ref):
    """One grid step == one batch element.

    ind_ref    : (B, M) int32 in SMEM (scalar prefetch)
    feat_ref   : (1, HW, D) input dtype, VMEM
    mask_ref   : (1, M, 1)  f32, VMEM
    target_ref : (1, M, D)  VMEM
    loss_ref   : (1, 1, D)  f32 output (per-batch partial sum over objects)
    pred_ref   : (M, D)     f32 VMEM scratch (gathered predictions)
    """
    b = pl.program_id(0)
    M = target_ref.shape[1]

    # ---- _transpose_and_gather_feat: direct gather via SMEM indices -------------
    def gather_one(m, carry):
        idx = ind_ref[b, m]                                   # scalar read from SMEM
        row = feat_ref[0, pl.ds(idx, 1), :]                   # (1, D) dynamic-sublane slice
        pred_ref[pl.ds(m, 1), :] = row.astype(jnp.float32)
        return carry

    lax.fori_loop(0, M, gather_one, 0, unroll=min(8, M))

    # ---- _reg_loss (masked L1), vectorized over (M, D) ---------------------------
    pred = pred_ref[...]                                      # (M, D) f32
    tgt = target_ref[0].astype(jnp.float32)                   # (M, D)
    msk = mask_ref[0]                                         # (M, 1) f32
    # Mirrors torch exactly (including 0 * NaN = NaN behavior of the reference).
    w = msk * jnp.logical_not(jnp.isnan(tgt)).astype(jnp.float32)   # (M, D)
    l = jnp.abs(pred * w - tgt * w)                           # (M, D)
    # Per-batch partial: sum over objects -> (1, 1, D).
    loss_ref[...] = jnp.sum(l, axis=0, keepdims=True).reshape(1, 1, -1)


def reg_loss_centernet(output_nchw, mask, ind=None, target=None):
    """Forward pass of RegLossCenterNet. Returns loss of shape (D,)."""
    if ind is None:
        # TODO(synk): ind=None path (output already gathered, shape (B, M[, D])) not implemented.
        raise NotImplementedError("ind=None path not implemented in the Pallas kernel")

    B, D, H, W = output_nchw.shape
    M = ind.shape[1]
    HW = H * W

    # Layout glue: NCHW -> (B, HW, D) so the gather index lands on the sublane axis.
    # (kept in XLA on purpose — see header comment; kept in the input dtype so bf16
    #  feature maps only move half the bytes).
    feat = jnp.transpose(output_nchw, (0, 2, 3, 1)).reshape(B, HW, D)
    mask_f = mask.astype(jnp.float32).reshape(B, M, 1)
    ind_i = ind.astype(jnp.int32)

    grid_spec = pltpu.PrefetchScalarGridSpec(
        num_scalar_prefetch=1,                                 # ind -> SMEM
        grid=(B,),
        in_specs=[
            pl.BlockSpec((1, HW, D), lambda b, ind_s: (b, 0, 0)),   # feat
            pl.BlockSpec((1, M, 1), lambda b, ind_s: (b, 0, 0)),    # mask
            pl.BlockSpec((1, M, D), lambda b, ind_s: (b, 0, 0)),    # target
        ],
        out_specs=pl.BlockSpec((1, 1, D), lambda b, ind_s: (b, 0, 0)),
        scratch_shapes=[pltpu.VMEM((M, D), jnp.float32)],      # gathered pred
    )

    partial = pl.pallas_call(
        _reg_loss_kernel,
        out_shape=jax.ShapeDtypeStruct((B, 1, D), jnp.float32),
        grid_spec=grid_spec,
        compiler_params=pltpu.CompilerParams(
            dimension_semantics=("parallel",),                 # megacore on v7x
            vmem_limit_bytes=48 * 1024 * 1024,                 # room for large HW feat blocks
        ),
    )(ind_i, feat, mask_f, target)

    # Finalize (per review): num computed once, divide applied once.
    num = jnp.sum(mask_f)
    loss = jnp.sum(partial, axis=(0, 1)) / jnp.maximum(num, 1.0)   # (D,)
    return loss


def _reference(output_nchw, mask, ind, target):
    """Pure-JAX reference mirroring the PyTorch code."""
    B, D, H, W = output_nchw.shape
    feat = jnp.transpose(output_nchw, (0, 2, 3, 1)).reshape(B, H * W, D)
    pred = jnp.take_along_axis(feat, ind[:, :, None].astype(jnp.int32), axis=1)
    num = jnp.sum(mask.astype(jnp.float32))
    m = mask.astype(jnp.float32)[:, :, None] * (~jnp.isnan(target)).astype(jnp.float32)
    regr = pred * m
    gt = target * m
    loss = jnp.abs(regr - gt)
    loss = jnp.sum(loss, axis=(0, 1))
    return loss / jnp.maximum(num, 1.0)


if __name__ == "__main__":
    key = jax.random.PRNGKey(0)
    k1, k2, k3, k4 = jax.random.split(key, 4)

    B, D, H, W, M = 2, 4, 16, 16, 8

    output = jax.random.normal(k1, (B, D, H, W), dtype=jnp.float32)
    target = jax.random.normal(k2, (B, M, D), dtype=jnp.float32)
    ind = jax.random.randint(k3, (B, M), 0, H * W, dtype=jnp.int32)
    mask = (jax.random.uniform(k4, (B, M)) > 0.3).astype(jnp.float32)

    loss = reg_loss_centernet(output, mask, ind, target)
    loss = jax.block_until_ready(loss)

    ref = _reference(output, mask, ind, target)
    assert loss.shape == (D,)
    assert jnp.allclose(loss, ref, atol=1e-5, rtol=1e-5), (loss, ref)

    print("KERNEL_OK")
</pallas_src>

<mosaic_0001>
module attributes {stable_mosaic.version = 11 : i64} {
  func.func @_reg_loss_kernel(%arg0: i32, %arg1: memref<2x8xi32, #tpu.memory_space<smem>>, %arg2: memref<1x256x4xf32, #tpu.memory_space<vmem>>, %arg3: memref<1x8x1xf32, #tpu.memory_space<vmem>>, %arg4: memref<1x8x4xf32, #tpu.memory_space<vmem>>, %arg5: memref<1x1x4xf32, #tpu.memory_space<vmem>>, %arg6: memref<8x4xf32, #tpu.memory_space<vmem>>) attributes {dimension_semantics = [#tpu.dimension_semantics<parallel>], iteration_bounds = array<i64: 2>, scalar_prefetch = 1 : i64, scratch_operands = 1 : i64, tpu.core_type = #tpu.core_type<tc>, window_params = [{transform_indices = @transform_0, window_bounds = array<i64: 1, 256, 4>}, {transform_indices = @transform_1, window_bounds = array<i64: 1, 8, 1>}, {transform_indices = @transform_2, window_bounds = array<i64: 1, 8, 4>}, {transform_indices = @transform_3, window_bounds = array<i64: 1, 1, 4>}]} {
    %c0_i32 = arith.constant 0 : i32
    %0 = arith.index_cast %arg0 : i32 to index
    %1 = arith.index_cast %c0_i32 : i32 to index
    %2 = memref.load %arg1[%0, %1] : memref<2x8xi32, #tpu.memory_space<smem>>
    %c0 = arith.constant 0 : index
    %3 = arith.index_cast %2 : i32 to index
    %c0_0 = arith.constant 0 : index
    %4 = vector.load %arg2[%c0, %3, %c0_0] : memref<1x256x4xf32, #tpu.memory_space<vmem>>, vector<1x1x4xf32>
    %5 = vector.shape_cast %4 : vector<1x1x4xf32> to vector<1x4xf32>
    %6 = arith.index_cast %c0_i32 : i32 to index
    %c0_1 = arith.constant 0 : index
    %7 = vector.load %arg6[%6, %c0_1] : memref<8x4xf32, #tpu.memory_space<vmem>>, vector<1x4xf32>
    tpu.vector_store %arg6[%6, %c0_1], %5 {strides = array<i32>} : memref<8x4xf32, #tpu.memory_space<vmem>>, vector<1x4xf32>,
    %c1_i32 = arith.constant 1 : i32
    %8 = arith.index_cast %arg0 : i32 to index
    %9 = arith.index_cast %c1_i32 : i32 to index
    %10 = memref.load %arg1[%8, %9] : memref<2x8xi32, #tpu.memory_space<smem>>
    %c0_2 = arith.constant 0 : index
    %11 = arith.index_cast %10 : i32 to index
    %c0_3 = arith.constant 0 : index
    %12 = vector.load %arg2[%c0_2, %11, %c0_3] : memref<1x256x4xf32, #tpu.memory_space<vmem>>, vector<1x1x4xf32>
    %13 = vector.shape_cast %12 : vector<1x1x4xf32> to vector<1x4xf32>
    %14 = arith.index_cast %c1_i32 : i32 to index
    %c0_4 = arith.constant 0 : index
    %15 = vector.load %arg6[%14, %c0_4] : memref<8x4xf32, #tpu.memory_space<vmem>>, vector<1x4xf32>
    tpu.vector_store %arg6[%14, %c0_4], %13 {strides = array<i32>} : memref<8x4xf32, #tpu.memory_space<vmem>>, vector<1x4xf32>,
    %c2_i32 = arith.constant 2 : i32
    %16 = arith.index_cast %arg0 : i32 to index
    %17 = arith.index_cast %c2_i32 : i32 to index
    %18 = memref.load %arg1[%16, %17] : memref<2x8xi32, #tpu.memory_space<smem>>
    %c0_5 = arith.constant 0 : index
    %19 = arith.index_cast %18 : i32 to index
    %c0_6 = arith.constant 0 : index
    %20 = vector.load %arg2[%c0_5, %19, %c0_6] : memref<1x256x4xf32, #tpu.memory_space<vmem>>, vector<1x1x4xf32>
    %21 = vector.shape_cast %20 : vector<1x1x4xf32> to vector<1x4xf32>
    %22 = arith.index_cast %c2_i32 : i32 to index
    %c0_7 = arith.constant 0 : index
    %23 = vector.load %arg6[%22, %c0_7] : memref<8x4xf32, #tpu.memory_space<vmem>>, vector<1x4xf32>
    tpu.vector_store %arg6[%22, %c0_7], %21 {strides = array<i32>} : memref<8x4xf32, #tpu.memory_space<vmem>>, vector<1x4xf32>,
    %c3_i32 = arith.constant 3 : i32
    %24 = arith.index_cast %arg0 : i32 to index
    %25 = arith.index_cast %c3_i32 : i32 to index
    %26 = memref.load %arg1[%24, %25] : memref<2x8xi32, #tpu.memory_space<smem>>
    %c0_8 = arith.constant 0 : index
    %27 = arith.index_cast %26 : i32 to index
    %c0_9 = arith.constant 0 : index
    %28 = vector.load %arg2[%c0_8, %27, %c0_9] : memref<1x256x4xf32, #tpu.memory_space<vmem>>, vector<1x1x4xf32>
    %29 = vector.shape_cast %28 : vector<1x1x4xf32> to vector<1x4xf32>
    %30 = arith.index_cast %c3_i32 : i32 to index
    %c0_10 = arith.constant 0 : index
    %31 = vector.load %arg6[%30, %c0_10] : memref<8x4xf32, #tpu.memory_space<vmem>>, vector<1x4xf32>
    tpu.vector_store %arg6[%30, %c0_10], %29 {strides = array<i32>} : memref<8x4xf32, #tpu.memory_space<vmem>>, vector<1x4xf32>,
    %c4_i32 = arith.constant 4 : i32
    %32 = arith.index_cast %arg0 : i32 to index
    %33 = arith.index_cast %c4_i32 : i32 to index
    %34 = memref.load %arg1[%32, %33] : memref<2x8xi32, #tpu.memory_space<smem>>
    %c0_11 = arith.constant 0 : index
    %35 = arith.index_cast %34 : i32 to index
    %c0_12 = arith.constant 0 : index
    %36 = vector.load %arg2[%c0_11, %35, %c0_12] : memref<1x256x4xf32, #tpu.memory_space<vmem>>, vector<1x1x4xf32>
    %37 = vector.shape_cast %36 : vector<1x1x4xf32> to vector<1x4xf32>
    %38 = arith.index_cast %c4_i32 : i32 to index
    %c0_13 = arith.constant 0 : index
    %39 = vector.load %arg6[%38, %c0_13] : memref<8x4xf32, #tpu.memory_space<vmem>>, vector<1x4xf32>
    tpu.vector_store %arg6[%38, %c0_13], %37 {strides = array<i32>} : memref<8x4xf32, #tpu.memory_space<vmem>>, vector<1x4xf32>,
    %c5_i32 = arith.constant 5 : i32
    %40 = arith.index_cast %arg0 : i32 to index
    %41 = arith.index_cast %c5_i32 : i32 to index
    %42 = memref.load %arg1[%40, %41] : memref<2x8xi32, #tpu.memory_space<smem>>
    %c0_14 = arith.constant 0 : index
    %43 = arith.index_cast %42 : i32 to index
    %c0_15 = arith.constant 0 : index
    %44 = vector.load %arg2[%c0_14, %43, %c0_15] : memref<1x256x4xf32, #tpu.memory_space<vmem>>, vector<1x1x4xf32>
    %45 = vector.shape_cast %44 : vector<1x1x4xf32> to vector<1x4xf32>
    %46 = arith.index_cast %c5_i32 : i32 to index
    %c0_16 = arith.constant 0 : index
    %47 = vector.load %arg6[%46, %c0_16] : memref<8x4xf32, #tpu.memory_space<vmem>>, vector<1x4xf32>
    tpu.vector_store %arg6[%46, %c0_16], %45 {strides = array<i32>} : memref<8x4xf32, #tpu.memory_space<vmem>>, vector<1x4xf32>,
    %c6_i32 = arith.constant 6 : i32
    %48 = arith.index_cast %arg0 : i32 to index
    %49 = arith.index_cast %c6_i32 : i32 to index
    %50 = memref.load %arg1[%48, %49] : memref<2x8xi32, #tpu.memory_space<smem>>
    %c0_17 = arith.constant 0 : index
    %51 = arith.index_cast %50 : i32 to index
    %c0_18 = arith.constant 0 : index
    %52 = vector.load %arg2[%c0_17, %51, %c0_18] : memref<1x256x4xf32, #tpu.memory_space<vmem>>, vector<1x1x4xf32>
    %53 = vector.shape_cast %52 : vector<1x1x4xf32> to vector<1x4xf32>
    %54 = arith.index_cast %c6_i32 : i32 to index
    %c0_19 = arith.constant 0 : index
    %55 = vector.load %arg6[%54, %c0_19] : memref<8x4xf32, #tpu.memory_space<vmem>>, vector<1x4xf32>
    tpu.vector_store %arg6[%54, %c0_19], %53 {strides = array<i32>} : memref<8x4xf32, #tpu.memory_space<vmem>>, vector<1x4xf32>,
    %c7_i32 = arith.constant 7 : i32
    %56 = arith.index_cast %arg0 : i32 to index
    %57 = arith.index_cast %c7_i32 : i32 to index
    %58 = memref.load %arg1[%56, %57] : memref<2x8xi32, #tpu.memory_space<smem>>
    %c0_20 = arith.constant 0 : index
    %59 = arith.index_cast %58 : i32 to index
    %c0_21 = arith.constant 0 : index
    %60 = vector.load %arg2[%c0_20, %59, %c0_21] : memref<1x256x4xf32, #tpu.memory_space<vmem>>, vector<1x1x4xf32>
    %61 = vector.shape_cast %60 : vector<1x1x4xf32> to vector<1x4xf32>
    %62 = arith.index_cast %c7_i32 : i32 to index
    %c0_22 = arith.constant 0 : index
    %63 = vector.load %arg6[%62, %c0_22] : memref<8x4xf32, #tpu.memory_space<vmem>>, vector<1x4xf32>
    tpu.vector_store %arg6[%62, %c0_22], %61 {strides = array<i32>} : memref<8x4xf32, #tpu.memory_space<vmem>>, vector<1x4xf32>,
    %c8_i32 = arith.constant 8 : i32
    %c0_23 = arith.constant 0 : index
    %c0_24 = arith.constant 0 : index
    %64 = vector.load %arg6[%c0_23, %c0_24] : memref<8x4xf32, #tpu.memory_space<vmem>>, vector<8x4xf32>
    %c0_25 = arith.constant 0 : index
    %c0_26 = arith.constant 0 : index
    %c0_27 = arith.constant 0 : index
    %65 = vector.load %arg4[%c0_25, %c0_26, %c0_27] : memref<1x8x4xf32, #tpu.memory_space<vmem>>, vector<1x8x4xf32>
    %66 = vector.shape_cast %65 : vector<1x8x4xf32> to vector<8x4xf32>
    %c0_28 = arith.constant 0 : index
    %c0_29 = arith.constant 0 : index
    %c0_30 = arith.constant 0 : index
    %67 = vector.load %arg3[%c0_28, %c0_29, %c0_30] : memref<1x8x1xf32, #tpu.memory_space<vmem>>, vector<1x8x1xf32>
    %68 = vector.shape_cast %67 : vector<1x8x1xf32> to vector<8x1xf32>
    %69 = arith.cmpf one, %66, %66 : vector<8x4xf32>
    %cst = arith.constant dense<true> : vector<8x4xi1>
    %70 = arith.xori %69, %cst : vector<8x4xi1>
    %71 = arith.extui %70 : vector<8x4xi1> to vector<8x4xi32>
    %72 = arith.sitofp %71 : vector<8x4xi32> to vector<8x4xf32>
    %73 = vector.broadcast %68 : vector<8x1xf32> to vector<8x4xf32>
    %74 = arith.mulf %73, %72 : vector<8x4xf32>
    %75 = arith.mulf %64, %74 : vector<8x4xf32>
    %76 = arith.mulf %66, %74 : vector<8x4xf32>
    %77 = arith.subf %75, %76 : vector<8x4xf32>
    %78 = math.absf %77 : vector<8x4xf32>
    %cst_31 = arith.constant dense<0.000000e+00> : vector<4xf32>
    %79 = vector.multi_reduction <add>, %78, %cst_31 [0] : vector<8x4xf32> to vector<4xf32>
    %80 = vector.shape_cast %79 : vector<4xf32> to vector<1x4xf32>
    %81 = vector.shape_cast %80 : vector<1x4xf32> to vector<1x1x4xf32>
    %c0_32 = arith.constant 0 : index
    %c0_33 = arith.constant 0 : index
    %c0_34 = arith.constant 0 : index
    %82 = vector.load %arg5[%c0_32, %c0_33, %c0_34] : memref<1x1x4xf32, #tpu.memory_space<vmem>>, vector<1x1x4xf32>
    tpu.vector_store %arg5[%c0_32, %c0_33, %c0_34], %81 {strides = array<i32>} : memref<1x1x4xf32, #tpu.memory_space<vmem>>, vector<1x1x4xf32>,
    return
  }
  func.func @transform_0(%arg0: i32, %arg1: memref<2x8xi32, #tpu.memory_space<smem>>) -> (i32, i32, i32) {
    %c0_i32 = arith.constant 0 : i32
    %c0_i32_0 = arith.constant 0 : i32
    %c0_i32_1 = arith.constant 0 : i32
    return %arg0, %c0_i32, %c0_i32_0 : i32, i32, i32
  }
  func.func @transform_1(%arg0: i32, %arg1: memref<2x8xi32, #tpu.memory_space<smem>>) -> (i32, i32, i32) {
    %c0_i32 = arith.constant 0 : i32
    %c0_i32_0 = arith.constant 0 : i32
    %c0_i32_1 = arith.constant 0 : i32
    return %arg0, %c0_i32, %c0_i32_0 : i32, i32, i32
  }
  func.func @transform_2(%arg0: i32, %arg1: memref<2x8xi32, #tpu.memory_space<smem>>) -> (i32, i32, i32) {
    %c0_i32 = arith.constant 0 : i32
    %c0_i32_0 = arith.constant 0 : i32
    %c0_i32_1 = arith.constant 0 : i32
    return %arg0, %c0_i32, %c0_i32_0 : i32, i32, i32
  }
  func.func @transform_3(%arg0: i32, %arg1: memref<2x8xi32, #tpu.memory_space<smem>>) -> (i32, i32, i32) {
    %c0_i32 = arith.constant 0 : i32
    %c0_i32_0 = arith.constant 0 : i32
    %c0_i32_1 = arith.constant 0 : i32
    return %arg0, %c0_i32, %c0_i32_0 : i32, i32, i32
  }
}

</mosaic_0001>

<bundles_post_ra>
// kernel: tpu_custom_call.1
= control target key start
LH: loop header
LB: loop body
LE: loop exit
PB: predicated region body
PF: predicated region fallthrough
CT: control target
= control target key end

     0   :  { %s654_s0 = inlined_call_operand.vmem [shape: s32[2,8], index: 0, kind: input, shape index: {}]   ;;  %s655_s1 = inlined_call_operand.vmem [shape: f32[2,256,4], index: 1, kind: input, shape index: {}]   ;;  %s656_s2 = inlined_call_operand.vmem [shape: f32[2,8,1], index: 2, kind: input, shape index: {}]   ;;  %s657_s3 = inlined_call_operand.vmem [shape: f32[2,8,4], index: 3, kind: input, shape index: {}]   ;;  %s658_s4 = inlined_call_operand.hbm [shape: f32[2,1,4], index: 4, kind: output, shape index: {}]  }
   0x1   :  { %s9_s17 = sshll.u32 %s654_s0, 4  ;;  %s10_s17 = int_to_ptr.vmem [resolvable:$true] %s9_s17 }
   0x2   :  { %s434_s18 = scalar_lea.vmem %s10_s17, 32  ;;  %p439_p1 = scmp.lt.s32.totalorder %s10_s17, %s10_s17 }
   0x3   :  { %p435_p0 = scmp.ne.s32.totalorder %s10_s17, %s434_s18  ;;  %p440_p2 = scmp.lt.s32.totalorder %s434_s18, %s434_s18 }
   0x5   :  { %p441_p3 = por %p440_p2, %p439_p1 }
   0x7   :  { %p442_p4 = pnand %p441_p3, %p435_p0 }
   0x9   :  { %445 = shalt.err (!%p442_p4)  }
   0xa   :  { %s510_s19 = smov [#allocation4]  }
   0xb   :  { %12 = dma.vmem_to_smem %s10_s17, 32, %s510_s19, [#allocation3] }
   0xc   :  { %488 = dma.done.wait [#allocation3], 32 }
   0xd   :  { %489 = vsyncadd [#allocation3], 4294967264 }
   0xe   :  { %14 = sfence }
   0xf   :  { %15 = vsyncpa [#allocation6], 0 }
  0x10   :  { %17 = vsyncpa [#allocation6 + $0x1], 0  ;;  %s543_s20 = smov 0   ;;  %s545_s21 = smov 0  }
  0x11   :  { %s547_s0 = smov 0   ;;  %s549_s22 = smov 0  }
  0x12 LB: > { %664 = sst [smem:[#allocation9_spill]] %s496_s20  ;;  %s564_s23 = sadd.s32 4294967295, %s508_s22   ;;  %s508_s22 = sphi %s549_s22, %s673_s22   ;;  %s504_s0 = sphi %s547_s0, %s675_s0   ;;  %s500_s21 = sphi %s545_s21, %s677_s21   ;;  %s496_s20 = sphi %s543_s20, %s676_s20  }
  0x13   : > { %665 = sst [smem:[#allocation10_spill]] %s504_s0  ;;  %s376_s24 = sadd.s32 4294967294, %s508_s22  }
  0x14   : > { %s568_s25 = sadd.s32 1, %s508_s22   ;;  %s108_s26 = sadd.s32 1, %s504_s0 }
  0x15   : > { %666 = sst [smem:[#allocation11_spill]] %s568_s25  ;;  %s105_s27 = ssub.s32 %s508_s22, %s568_s25 }
  0x16   : > { %p118_p5 = scmp.ne.s32.totalorder %s504_s0, %s500_s21  ;;  %p106_p6 = scmp.eq.s32.totalorder %s105_s27, 0 }
  0x17   : > { %p119_p7 = scmp.eq.s32.totalorder %s564_s23, 1  ;;  %p124_p8 = scmp.ne.s32.totalorder %s500_s21, %s496_s20 }
  0x18   : > { %p125_p9 = scmp.eq.s32.totalorder %s376_s24, 1  ;;  %p379_p12 = scmp.ge.s32.totalorder %s508_s22, 1 }
  0x19   : > { %s579_s28 = scalar_select %p106_p6, %s504_s0, %s108_s26  }
  0x1a   : > { %p581_p10 = por %p119_p7, %p118_p5  ;;  %p585_p11 = por %p125_p9, %p124_p8 }
  0x1b   : > { %667 = sst [smem:[#allocation12_spill]] %s579_s28  ;;  %p165_p13 = scmp.lt.s32.totalorder %s508_s22, 3 }
  0x1c   : > { %s669_s30 = scalar_select %p585_p11, 1, 0 }
  0x1d   : > { %p166_p0 = pnand %p379_p12, %p165_p13 }
  0x1e   : > { %670 = sst [smem:[#allocation13_spill]] %s669_s30  ;;  %p196_p1 = scmp.lt.s32.totalorder (!%p166_p0), %s564_s23, 1 }
  0x1f   : > { %169 = sbr.rel (%p166_p0) target bundleno = 199 (0xc7), region = 32  ;;  %s384_s5 = sshll.u32 (!%p166_p0), %s564_s23, 7 }
  0x20   : > { %s215_s6 = sadd.s32 (!%p166_p0), 1, %s384_s5  ;;  %s210_s8 = sld [smem:[#allocation4 + %s384_s5]] (!%p166_p0) }
  0x21   : > { %s220_s9 = sadd.s32 (!%p166_p0), 2, %s384_s5  ;;  %s216_s11 = sld [smem:[#allocation4 + %s215_s6]] (!%p166_p0) }
  0x22   : > { %s221_s15 = sld [smem:[#allocation4 + %s220_s9]] (!%p166_p0)  ;;  %s225_s16 = sadd.s32 (!%p166_p0), 3, %s384_s5 }
  0x23   : > { %s230_s17 = sadd.s32 (!%p166_p0), 4, %s384_s5  ;;  %s226_s18 = sld [smem:[#allocation4 + %s225_s16]] (!%p166_p0) }
  0x24   : > { %v511_v0 = vmov 0   ;;  %s594_s7 = scalar_select %p196_p1, %s564_s23, 1  ;;  %vm213_vm0 = vcmask 24576   ;;  %vm512_vm2 = vmmov 1   ;;  %v513_v11 = vmov 0.0  }
  0x25   : > { %433 = vset.pattern.permute.xlu0 %v511_v0  ;;  %s235_s19 = sadd.s32 5, %s384_s5  ;;  %s231_s24 = sld [smem:[#allocation4 + %s230_s17]]  ;;  %vm267_vm4 = vcmask 31744  }
  0x26   : > { %s382_s10 = sshll.u32 %s594_s7, 3  ;;  %s240_s26 = sadd.s32 6, %s384_s5 }
  0x27   : > { %s204_s14 = scalar_lea.vmem %s656_s2, %s382_s10  ;;  %s236_s27 = sld [smem:[#allocation4 + %s235_s19]] }
  0x28   : > { %v252_v1 = vld [vmem:[%s204_s14] sm:$0xff]  ;;  %s245_s28 = sadd.s32 7, %s384_s5  ;;  %s241_s0 = sld [smem:[#allocation4 + %s240_s26]] }
  0x29   : > { %259 = vperm.xlu0 %433, %v252_v1   ;;  %s389_s25 = sshll.u32 %s594_s7, 8  ;;  %s246_s6 = sld [smem:[#allocation4 + %s245_s28]] }
  0x2a   : > { %s200_s12 = scalar_lea.vmem %s655_s1, %s389_s25  ;;  %s386_s7 = sshll.u32 %s564_s23, 4 }
  0x2b   : > { %s211_s13 = scalar_lea.vmem %s200_s12, %s210_s8  ;;  %s217_s9 = scalar_lea.vmem %s200_s12, %s216_s11 }
  0x2c   : > { %v212_v2 = vld [vmem:[%s211_s13] sm:$0x1]  ;;  %s222_s14 = scalar_lea.vmem %s200_s12, %s221_s15  ;;  %s227_s16 = scalar_lea.vmem %s200_s12, %s226_s18 }
  0x2d   : > { %v218_v3 = vld [vmem:[%s217_s9] sm:$0x1]  ;;  %214 = vst.msk [vmem:[#allocation2] sm:$0x1] %vm213_vm0, %v212_v2  ;;  %s232_s5 = scalar_lea.vmem %s200_s12, %s231_s24  ;;  %s237_s20 = scalar_lea.vmem %s200_s12, %s236_s27 }
  0x2e   : > { %219 = vst.msk [vmem:[#allocation2 + $0x1] sm:$0x1] %vm213_vm0, %v218_v3  ;;  %v223_v4 = vld [vmem:[%s222_s14] sm:$0x1]  ;;  %s242_s25 = scalar_lea.vmem %s200_s12, %s241_s0  ;;  %s208_s11 = scalar_lea.vmem %s657_s3, %s382_s10 }
  0x2f   : > { %v228_v5 = vld [vmem:[%s227_s16] sm:$0x1]  ;;  %224 = vst.msk [vmem:[#allocation2 + $0x2] sm:$0x1] %vm213_vm0, %v223_v4  ;;  %s247_s28 = scalar_lea.vmem %s200_s12, %s246_s6  ;;  %s194_s0 = sand.u32 1, %s500_s21  }
  0x30   : > { %229 = vst.msk [vmem:[#allocation2 + $0x3] sm:$0x1] %vm213_vm0, %v228_v5  ;;  %v233_v6 = vld [vmem:[%s232_s5] sm:$0x1]  ;;  %s195_s10 = scalar_lea.vmem [#allocation5], %s194_s0  ;;  %s287_s19 = scalar_lea.hbm %s658_s4, %s386_s7 }
  0x31   : > { %234 = vst.msk [vmem:[#allocation2 + $0x4] sm:$0x1] %vm213_vm0, %v233_v6  ;;  %v238_v7 = vld [vmem:[%s237_s20] sm:$0x1]  ;;  %s289_s15 = sshll.u32 %s195_s10, 4  ;;  %s277_s24 = scalar_lea.sflag [#allocation6], %s194_s0  ;;  %s290_s15 = int_to_ptr.vmem [resolvable:$true] %s289_s15 }
  0x32   : > { %239 = vst.msk [vmem:[#allocation2 + $0x5] sm:$0x1] %vm213_vm0, %v238_v7  ;;  %v243_v8 = vld [vmem:[%s242_s25] sm:$0x1]  ;;  %s446_s26 = scalar_lea.vmem %s290_s15, 16  ;;  %s514_s27 = smov [#allocation5]  }
  0x33   : > { %244 = vst.msk [vmem:[#allocation2 + $0x6] sm:$0x1] %vm213_vm0, %v243_v8  ;;  %v248_v9 = vld [vmem:[%s247_s28] sm:$0x1]  ;;  %p447_p2 = scmp.ne.s32.totalorder %s290_s15, %s446_s26  ;;  %s450_s6 = sshll.u32 %s514_s27, 4  ;;  %s451_s6 = int_to_ptr.vmem [resolvable:$false] %s450_s6 }
  0x34   : > { %249 = vst.msk [vmem:[#allocation2 + $0x7] sm:$0x1] %vm213_vm0, %v248_v9  ;;  %v251_v10 = vld [vmem:[%s208_s11] sm:$0xff]  ;;  %s452_s23 = scalar_lea.vmem %s451_s6, 32  ;;  %p453_p5 = scmp.lt.s32.totalorder %s290_s15, %s451_s6 }
  0x35   : > { %vm253_vm1 = vcmp.ne.f32.partialorder %v251_v10, %v251_v10  ;;  %p448_p3 = pnand %p447_p2, %p581_p10  ;;  %p454_p6 = scmp.lt.s32.totalorder %s452_s23, %s446_s26 }
  0x36   : > { %vm254_vm3 = vmxor %vm253_vm1, %vm512_vm2 }
  0x37   : > { %v385_v12 = vsel %vm254_vm3, 1.0, %v513_v11  ;;  %p449_p4 = pneg %p448_p3  ;;  %p455_p7 = por %p454_p6, %p453_p5 }
  0x39   : > { %p456_p8 = pnand %p455_p7, %p449_p4 }
  0x3b   : > { %v250_v14 = vld [vmem:[#allocation2] sm:$0xff] }
  0xa4   : > { %v260_v13 = vpop.permute.xlu0 %259 }
  0xa5   : > { %v262_v15 = vmul.f32 %v385_v12, %v260_v13 }
  0xa7   : > { %v263_v16 = vmul.f32 %v262_v15, %v250_v14  ;;  %v264_v17 = vmul.f32 %v262_v15, %v251_v10 }
  0xa9   : > { %v265_v18 = vsub.f32 %v263_v16, %v264_v17 }
  0xab   : > { %v266_v19 = vand.u32 2147483647, %v265_v18 }
  0xad   : > { %v268_v20 = vsel %vm267_vm4, %v266_v19, 0.0 }
  0xae   : > { %v269_v21 = vrot.slane %v268_v20, 4 }
  0xb0   : > { %v270_v22 = vadd.f32 %v269_v21, %v268_v20 }
  0xb2   : > { %v271_v23 = vrot.slane %v270_v22, 2 }
  0xb4   : > { %v272_v24 = vadd.f32 %v271_v23, %v270_v22 }
  0xb6   : > { %v273_v25 = vrot.slane %v272_v24, 1 }
  0xb8   : > { %v274_v26 = vadd.f32 %v273_v25, %v272_v24 }
  0xba   : > { %275 = vst.msk [vmem:[%s195_s10] sm:$0x1] %vm213_vm0, %v274_v26 }
  0xbb   : > { %459 = shalt.err (!%p456_p8)
}
  0xbc   : > { %s460_s12 = scalar_lea.hbm %s287_s19, 16  ;;  %s464_s14 = scalar_lea.hbm %s658_s4, 32 }
  0xbd   : > { %p461_p9 = scmp.ne.s32.totalorder %s287_s19, %s460_s12  ;;  %p465_p0 = scmp.lt.s32.totalorder %s287_s19, %s658_s4 }
  0xbe   : > { %p466_p1 = scmp.lt.s32.totalorder %s464_s14, %s460_s12 }
  0xbf   : > { %p462_p12 = pnand %p461_p9, %p581_p10 }
  0xc0   : > { %p467_p2 = por %p466_p1, %p465_p0 }
  0xc1   : > { %p463_p13 = pneg %p462_p12 }
  0xc3   : > { %p468_p3 = pnand %p467_p2, %p463_p13 }
  0xc5   : > { %471 = shalt.err (!%p468_p3)
}
  0xc6   : > { %390 = dma.vmem_to_hbm [thread:$0]  (%p581_p10), %s290_s15, 16, %s287_s19, %s277_s24  }
  0xc7 PF: > { %s671_s20 = sld [smem:[#allocation9_spill]]  ;;  %p396_p4 = scmp.ge.s32.totalorder %s508_s22, 2 }
  0xc9   : > { %p393_p5 = pnand %p396_p4, %p585_p11 }
  0xcb   : > { %p394_p6 = pneg %p393_p5 }
  0xcd   : > { %s301_s28 = sand.u32 1, %s671_s20  }
  0xce   : > { %s302_s30 = scalar_lea.sflag [#allocation6], %s301_s28 }
  0xcf   : > { %491 = dma.done.wait (%p394_p6), %s302_s30, 16  }
  0xd0   : > { %493 = vsyncadd (%p394_p6), %s302_s30, 4294967280  ;;  %s673_s22 = sld [smem:[#allocation11_spill]]  ;;  %s676_s20 = smov %s500_s21 }
  0xd1   : > { %s674_s8 = sld [smem:[#allocation10_spill]] }
  0xd2   : > { %s675_s0 = sld [smem:[#allocation12_spill]] }
  0xd6   : > { %p20_p7 = scmp.ge.s32.totalorder %s673_s22, 4  }
  0xd7   : > { %s677_s21 = smov %s674_s8 }
  0xd8   :  { %22 = sbr.rel (!%p20_p7) target bundleno = 18 (0x12), region = 81 }
  0xdd   :  { %306 = vsyncpa [#allocation6], 1 }
  0xde   :  { %308 = vsyncpa [#allocation6 + $0x1], 1 }

</bundles_post_ra>
